<compile_context>
chip_gen: v7x
topology: tpu7x:2x2x1
jax: 0.10.0
libtpu: 0.0.40
codegen_flags: <defaults>
</compile_context>

<pallas_src>
import functools
import numpy as np
import jax
import jax.numpy as jnp
from jax.experimental import pallas as pl
from jax.experimental.pallas import tpu as pltpu

_LANE = 128


def _sublane_align(dtype):
    itemsize = jnp.dtype(dtype).itemsize
    return max(8, 32 // itemsize)        # 8 for f32, 16 for bf16, 32 for int8/fp8


def _largest_aligned_divisor(extent, align, cap):
    """Largest d with d % align == 0, extent % d == 0 and d <= cap, else None."""
    cap = min(int(cap), int(extent))
    d = cap - (cap % align)
    while d >= align:
        if extent % d == 0:
            return d
        d -= align
    return None


def _pick_tile_dim(extent, align, cap):
    """Block dim for one axis: full extent if it fits the byte budget, else the
    largest evenly-dividing aligned tile <= cap, else an aligned tile with a
    masked tail (never exceeds cap -> never blows the VMEM budget)."""
    cap = max(align, int(cap))
    if extent <= cap:
        return extent                       # full array dim is always legal
    d = _largest_aligned_divisor(extent, align, cap)
    if d is not None:
        return d                            # dense, no masked tail
    return cap - (cap % align)              # aligned block, masked tail


def _gen_params():
    """(working-set budget, vmem_limit_bytes) keyed off the TPU generation.
    v7x: 64 MiB VMEM per TensorCore; v5e/v6e: 128 MiB (v5e default scoped limit
    is only 16 MiB, so we always pass vmem_limit_bytes explicitly)."""
    try:
        cap = int(pltpu.get_tpu_info().vmem_capacity_bytes)
    except Exception:
        cap = 64 << 20                      # conservative (v7x-class)
    if cap <= (64 << 20):
        return 20 << 20, 28 << 20           # v7x-class
    return 48 << 20, 64 << 20               # v5e / v6e


def _make_merge_kernel(num_inputs):
    def kernel(dw_ref, *refs):
        # dw_ref: (N, I) f32 in SMEM (scalar prefetch)
        # refs  : I input refs of block (1, ts, tl) + output ref (1, I, ts, tl)
        x_refs = refs[:num_inputs]
        o_ref = refs[num_inputs]
        n = pl.program_id(0)
        for i in range(num_inputs):                  # static unroll over modalities
            x = x_refs[i][0]
            w = dw_ref[n, i]                         # scalar read from SMEM (f32)
            if jnp.issubdtype(x.dtype, jnp.floating) and x.dtype != jnp.float32:
                # native low-precision multiply (bf16 VALU on v6e/v7x; the
                # compiler promotes on v5e) -> less vreg traffic per block
                o_ref[0, i] = x * w.astype(x.dtype)
            else:
                o_ref[0, i] = (x.astype(jnp.float32) * w).astype(o_ref.dtype)
    return kernel


def _merge_one_scale_pallas(xs, drop_weights):
    """xs: tuple of I arrays (N, C, H, W); drop_weights: (N, I) float32.
    Returns (N, I*C, H, W) == concat([xs[i] * drop_weights[:, i]], axis=1)."""
    num_inputs = len(xs)
    N, C, H, W = xs[0].shape
    dtype = xs[0].dtype
    itemsize = jnp.dtype(dtype).itemsize
    s_align = _sublane_align(dtype)
    P = C * H * W
    HW = H * W

    ws_budget, vmem_limit = _gen_params()
    # VMEM working set ~ 2 buffers x (I input blocks + one I-group output block)
    #                  = 4 * I * block_elems * itemsize
    elems_cap = max(s_align * _LANE, ws_budget // (4 * num_inputs * itemsize))
    elems_cap = min(elems_cap, (4 << 20) // itemsize)   # ~4 MiB/block is plenty
    lane_cap = max(_LANE, min(8192, elems_cap))

    # --- refold the per-sample plane into a dense (S, L) slab --------------
    if P % (s_align * _LANE) == 0:
        # L a multiple of 128 AND S a multiple of the sublane tile: dense lanes
        # and no sublane padding, independent of how C and H*W factor.
        L = _largest_aligned_divisor(P // s_align, _LANE, lane_cap)
        S = P // L
    elif P % _LANE == 0:
        L = _largest_aligned_divisor(P, _LANE, lane_cap)
        S = P // L
    else:
        # Misaligned plane (e.g. padded 20x20 grids): keep (C, H*W) and accept
        # a masked tail, clamped to the byte budget.
        S, L = C, HW

    xs_v = [x.reshape(N, S, L) for x in xs]              # metadata-only reshape

    tl = _pick_tile_dim(L, _LANE, lane_cap)
    ts = _pick_tile_dim(S, s_align, max(s_align, elems_cap // tl))

    # v7x has two TensorCores sharing HBM: make sure the parallel grid has >=2
    # tiles so both cores stream (harmless on v5e/v6e).
    if N * pl.cdiv(S, ts) * pl.cdiv(L, tl) < 2:
        d = _largest_aligned_divisor(S, s_align, S // 2)
        if d is not None and d < S:
            ts = d
        else:
            d = _largest_aligned_divisor(L, _LANE, L // 2)
            if d is not None and d < L:
                tl = d

    grid = (N, pl.cdiv(S, ts), pl.cdiv(L, tl))

    in_specs = [
        pl.BlockSpec((1, ts, tl), lambda n, s, l, dw: (n, s, l))
        for _ in range(num_inputs)
    ]
    # Output viewed as (N, I, S, L): modality i is written at group i, so the
    # channel-concat layout comes straight out of the kernel.
    out_spec = pl.BlockSpec((1, num_inputs, ts, tl),
                            lambda n, s, l, dw: (n, 0, s, l))

    y = pl.pallas_call(
        _make_merge_kernel(num_inputs),
        out_shape=jax.ShapeDtypeStruct((N, num_inputs, S, L), dtype),
        grid_spec=pltpu.PrefetchScalarGridSpec(
            num_scalar_prefetch=1,                       # drop_weights -> SMEM
            grid=grid,
            in_specs=in_specs,
            out_specs=out_spec,
        ),
        compiler_params=pltpu.CompilerParams(
            dimension_semantics=("parallel", "parallel", "parallel"),
            vmem_limit_bytes=int(vmem_limit)),
    )(drop_weights, *xs_v)

    # Metadata-only reshape to the NCHW concatenated layout.
    return y.reshape(N, num_inputs * C, H, W)


def _merge_one_scale_xla(xs, drop_weights):
    """Tiny-scale path: plain XLA fuses the broadcast-multiply into the concat."""
    N = xs[0].shape[0]
    parts = [(x * drop_weights[:, i].reshape(N, 1, 1, 1)).astype(x.dtype)
             for i, x in enumerate(xs)]
    return jnp.concatenate(parts, axis=1)


def merge_inputs_pallas(inputs, drop_weights, min_pallas_bytes=1 << 20):
    """Pallas version of BaseOccupancy2DPredictor.merge_inputs.

    inputs:       list (len = num_inputs) of lists (len = K) of arrays (N, C, H, W)
    drop_weights: (N, num_inputs) float32 (all ones in the reference module)
    returns:      list of K arrays of shape (N, num_inputs * C_k, H_k, W_k)
    """
    num_inputs = len(inputs)
    K = len(inputs[0])
    N = inputs[0][0].shape[0]
    dw = jnp.asarray(drop_weights, jnp.float32).reshape(N, num_inputs)
    out = []
    for k in range(K):
        xs = tuple(inputs[i][k] for i in range(num_inputs))
        nbytes = sum(int(np.prod(x.shape)) * jnp.dtype(x.dtype).itemsize for x in xs)
        if nbytes < min_pallas_bytes:
            out.append(_merge_one_scale_xla(xs, dw))
        else:
            out.append(_merge_one_scale_pallas(xs, dw))
    return out


def make_predictable_region(output_gridsize, output_padding):
    """Reproduces the registered `predictable_region` buffer (init-time glue)."""
    pr = jnp.ones((1, 1, output_gridsize[0], output_gridsize[1]), jnp.float32)
    p = int(output_padding)
    return jnp.pad(pr, ((0, 0), (0, 0), (p, p), (p, p)))


def compute_scales(enc_in_scale, output_gridsize, output_padding):
    """Reproduces the scale bookkeeping from __init__ (pure python/numpy glue)."""
    padded_enc_in_scale = np.array(enc_in_scale)
    for si in range(len(padded_enc_in_scale)):
        padded_enc_in_scale[si] += 2 * int(
            np.ceil(np.sqrt(2) * output_padding * padded_enc_in_scale[si]
                    / float(output_gridsize[si])))
    dec_out_scale = [sc + 2 * output_padding for sc in output_gridsize]
    model_out_scale = [sc + 2 * output_padding for sc in output_gridsize]
    return padded_enc_in_scale, dec_out_scale, model_out_scale


# TODO(synk): forward() of the reference module wires together external
# rgb/audio feature extractors, transformer encoders/decoders and kornia
# rotate/translate utilities (unet_parts / transformer_parts / model_utils /
# korntransforms) that are not provided here; only merge_inputs() and the
# predictable_region buffer / scale bookkeeping are implemented.


if __name__ == "__main__":
    key = jax.random.PRNGKey(0)

    # 2 modalities (rgb + audio encoders), K=3 multi-scale feature maps:
    # two 128-aligned planes plus one padded 20x20 level (HW % 128 != 0).
    N = 2
    num_inputs = 2
    shapes = [(N, 4, 16, 16), (N, 8, 32, 32), (N, 4, 20, 20)]
    K = len(shapes)

    keys = jax.random.split(key, num_inputs * K)
    inputs = [
        [jax.random.normal(keys[i * K + k], shapes[k], jnp.float32)
         for k in range(K)]
        for i in range(num_inputs)
    ]

    # Force the Pallas path for all scales (these test shapes are tiny, so the
    # default routing would send them all to the XLA fast path).
    merge_pallas = jax.jit(functools.partial(merge_inputs_pallas, min_pallas_bytes=0))
    merge_auto = jax.jit(merge_inputs_pallas)   # default: tiny scales -> XLA

    def reference(drop_weights):
        return [jnp.concatenate(
            [inputs[i][k] * drop_weights[:, i][:, None, None, None]
             for i in range(num_inputs)], axis=1) for k in range(K)]

    def check(fn, drop_weights):
        merged = [jax.block_until_ready(m) for m in fn(inputs, drop_weights)]
        refs = reference(drop_weights)
        for k in range(K):
            Ck, Hk, Wk = shapes[k][1], shapes[k][2], shapes[k][3]
            assert merged[k].shape == (N, num_inputs * Ck, Hk, Wk)
            assert jnp.allclose(merged[k], refs[k], atol=1e-6), "merge_inputs mismatch"

    # Reference builds all-ones drop weights of shape (num_samples, num_inputs, 1, 1, 1).
    ones = jnp.ones((N, num_inputs), jnp.float32)
    nontrivial = (jnp.arange(N * num_inputs, dtype=jnp.float32)
                  .reshape(N, num_inputs) + 1.0) * 0.5
    check(merge_pallas, ones)          # Pallas path, trivial weights
    check(merge_pallas, nontrivial)    # Pallas path, SMEM weight path exercised
    check(merge_auto, ones)            # default routing (XLA fallback for tiny scales)

    # Init-time buffer + scale bookkeeping (glue).
    pr = jax.block_until_ready(make_predictable_region((16, 16), 2))
    assert pr.shape == (1, 1, 20, 20)
    _ = compute_scales((16, 16), (16, 16), 2)

    print("KERNEL_OK")
</pallas_src>

<mosaic_0001>
module attributes {stable_mosaic.version = 11 : i64} {
  func.func @kernel(%arg0: i32, %arg1: i32, %arg2: i32, %arg3: memref<2x2xf32, #tpu.memory_space<smem>>, %arg4: memref<1x8x1024xf32, #tpu.memory_space<vmem>>, %arg5: memref<1x8x1024xf32, #tpu.memory_space<vmem>>, %arg6: memref<1x2x8x1024xf32, #tpu.memory_space<vmem>>) attributes {dimension_semantics = [#tpu.dimension_semantics<parallel>, #tpu.dimension_semantics<parallel>, #tpu.dimension_semantics<parallel>], iteration_bounds = array<i64: 2, 1, 1>, scalar_prefetch = 1 : i64, scratch_operands = 0 : i64, tpu.core_type = #tpu.core_type<tc>, window_params = [{transform_indices = @transform_0, window_bounds = array<i64: 1, 8, 1024>}, {transform_indices = @transform_1, window_bounds = array<i64: 1, 8, 1024>}, {transform_indices = @transform_2, window_bounds = array<i64: 1, 2, 8, 1024>}]} {
    %c0 = arith.constant 0 : index
    %c0_0 = arith.constant 0 : index
    %c0_1 = arith.constant 0 : index
    %0 = vector.load %arg4[%c0, %c0_0, %c0_1] : memref<1x8x1024xf32, #tpu.memory_space<vmem>>, vector<1x8x1024xf32>
    %1 = vector.shape_cast %0 : vector<1x8x1024xf32> to vector<8x1024xf32>
    %2 = arith.index_cast %arg0 : i32 to index
    %c0_2 = arith.constant 0 : index
    %3 = memref.load %arg3[%2, %c0_2] : memref<2x2xf32, #tpu.memory_space<smem>>
    %4 = vector.broadcast %3 : f32 to vector<8x1024xf32>
    %5 = arith.mulf %1, %4 : vector<8x1024xf32>
    %c0_3 = arith.constant 0 : index
    %c0_4 = arith.constant 0 : index
    %c0_5 = arith.constant 0 : index
    %c0_6 = arith.constant 0 : index
    %6 = vector.load %arg6[%c0_3, %c0_4, %c0_5, %c0_6] : memref<1x2x8x1024xf32, #tpu.memory_space<vmem>>, vector<1x1x8x1024xf32>
    %7 = vector.shape_cast %6 : vector<1x1x8x1024xf32> to vector<8x1024xf32>
    %8 = vector.shape_cast %5 : vector<8x1024xf32> to vector<1x1x8x1024xf32>
    tpu.vector_store %arg6[%c0_3, %c0_4, %c0_5, %c0_6], %8 {strides = array<i32>} : memref<1x2x8x1024xf32, #tpu.memory_space<vmem>>, vector<1x1x8x1024xf32>,
    %c0_7 = arith.constant 0 : index
    %c0_8 = arith.constant 0 : index
    %c0_9 = arith.constant 0 : index
    %9 = vector.load %arg5[%c0_7, %c0_8, %c0_9] : memref<1x8x1024xf32, #tpu.memory_space<vmem>>, vector<1x8x1024xf32>
    %10 = vector.shape_cast %9 : vector<1x8x1024xf32> to vector<8x1024xf32>
    %11 = arith.index_cast %arg0 : i32 to index
    %c1 = arith.constant 1 : index
    %12 = memref.load %arg3[%11, %c1] : memref<2x2xf32, #tpu.memory_space<smem>>
    %13 = vector.broadcast %12 : f32 to vector<8x1024xf32>
    %14 = arith.mulf %10, %13 : vector<8x1024xf32>
    %c0_10 = arith.constant 0 : index
    %c1_11 = arith.constant 1 : index
    %c0_12 = arith.constant 0 : index
    %c0_13 = arith.constant 0 : index
    %15 = vector.load %arg6[%c0_10, %c1_11, %c0_12, %c0_13] : memref<1x2x8x1024xf32, #tpu.memory_space<vmem>>, vector<1x1x8x1024xf32>
    %16 = vector.shape_cast %15 : vector<1x1x8x1024xf32> to vector<8x1024xf32>
    %17 = vector.shape_cast %14 : vector<8x1024xf32> to vector<1x1x8x1024xf32>
    tpu.vector_store %arg6[%c0_10, %c1_11, %c0_12, %c0_13], %17 {strides = array<i32>} : memref<1x2x8x1024xf32, #tpu.memory_space<vmem>>, vector<1x1x8x1024xf32>,
    return
  }
  func.func @transform_0(%arg0: i32, %arg1: i32, %arg2: i32, %arg3: memref<2x2xf32, #tpu.memory_space<smem>>) -> (i32, i32, i32) {
    %c0_i32 = arith.constant 0 : i32
    return %arg0, %arg1, %arg2 : i32, i32, i32
  }
  func.func @transform_1(%arg0: i32, %arg1: i32, %arg2: i32, %arg3: memref<2x2xf32, #tpu.memory_space<smem>>) -> (i32, i32, i32) {
    %c0_i32 = arith.constant 0 : i32
    return %arg0, %arg1, %arg2 : i32, i32, i32
  }
  func.func @transform_2(%arg0: i32, %arg1: i32, %arg2: i32, %arg3: memref<2x2xf32, #tpu.memory_space<smem>>) -> (i32, i32, i32, i32) {
    %c0_i32 = arith.constant 0 : i32
    %c0_i32_0 = arith.constant 0 : i32
    return %arg0, %c0_i32, %arg1, %arg2 : i32, i32, i32, i32
  }
}

module attributes {stable_mosaic.version = 11 : i64} {
  func.func @kernel(%arg0: i32, %arg1: i32, %arg2: i32, %arg3: memref<2x2xf32, #tpu.memory_space<smem>>, %arg4: memref<1x4x400xf32, #tpu.memory_space<vmem>>, %arg5: memref<1x4x400xf32, #tpu.memory_space<vmem>>, %arg6: memref<1x2x4x400xf32, #tpu.memory_space<vmem>>) attributes {dimension_semantics = [#tpu.dimension_semantics<parallel>, #tpu.dimension_semantics<parallel>, #tpu.dimension_semantics<parallel>], iteration_bounds = array<i64: 2, 1, 1>, scalar_prefetch = 1 : i64, scratch_operands = 0 : i64, tpu.core_type = #tpu.core_type<tc>, window_params = [{transform_indices = @transform_0, window_bounds = array<i64: 1, 4, 400>}, {transform_indices = @transform_1, window_bounds = array<i64: 1, 4, 400>}, {transform_indices = @transform_2, window_bounds = array<i64: 1, 2, 4, 400>}]} {
    %c0 = arith.constant 0 : index
    %c0_0 = arith.constant 0 : index
    %c0_1 = arith.constant 0 : index
    %0 = vector.load %arg4[%c0, %c0_0, %c0_1] : memref<1x4x400xf32, #tpu.memory_space<vmem>>, vector<1x4x400xf32>
    %1 = vector.shape_cast %0 : vector<1x4x400xf32> to vector<4x400xf32>
    %2 = arith.index_cast %arg0 : i32 to index
    %c0_2 = arith.constant 0 : index
    %3 = memref.load %arg3[%2, %c0_2] : memref<2x2xf32, #tpu.memory_space<smem>>
    %4 = vector.broadcast %3 : f32 to vector<4x400xf32>
    %5 = arith.mulf %1, %4 : vector<4x400xf32>
    %c0_3 = arith.constant 0 : index
    %c0_4 = arith.constant 0 : index
    %c0_5 = arith.constant 0 : index
    %c0_6 = arith.constant 0 : index
    %6 = vector.load %arg6[%c0_3, %c0_4, %c0_5, %c0_6] : memref<1x2x4x400xf32, #tpu.memory_space<vmem>>, vector<1x1x4x400xf32>
    %7 = vector.shape_cast %6 : vector<1x1x4x400xf32> to vector<4x400xf32>
    %8 = vector.shape_cast %5 : vector<4x400xf32> to vector<1x1x4x400xf32>
    tpu.vector_store %arg6[%c0_3, %c0_4, %c0_5, %c0_6], %8 {strides = array<i32>} : memref<1x2x4x400xf32, #tpu.memory_space<vmem>>, vector<1x1x4x400xf32>,
    %c0_7 = arith.constant 0 : index
    %c0_8 = arith.constant 0 : index
    %c0_9 = arith.constant 0 : index
    %9 = vector.load %arg5[%c0_7, %c0_8, %c0_9] : memref<1x4x400xf32, #tpu.memory_space<vmem>>, vector<1x4x400xf32>
    %10 = vector.shape_cast %9 : vector<1x4x400xf32> to vector<4x400xf32>
    %11 = arith.index_cast %arg0 : i32 to index
    %c1 = arith.constant 1 : index
    %12 = memref.load %arg3[%11, %c1] : memref<2x2xf32, #tpu.memory_space<smem>>
    %13 = vector.broadcast %12 : f32 to vector<4x400xf32>
    %14 = arith.mulf %10, %13 : vector<4x400xf32>
    %c0_10 = arith.constant 0 : index
    %c1_11 = arith.constant 1 : index
    %c0_12 = arith.constant 0 : index
    %c0_13 = arith.constant 0 : index
    %15 = vector.load %arg6[%c0_10, %c1_11, %c0_12, %c0_13] : memref<1x2x4x400xf32, #tpu.memory_space<vmem>>, vector<1x1x4x400xf32>
    %16 = vector.shape_cast %15 : vector<1x1x4x400xf32> to vector<4x400xf32>
    %17 = vector.shape_cast %14 : vector<4x400xf32> to vector<1x1x4x400xf32>
    tpu.vector_store %arg6[%c0_10, %c1_11, %c0_12, %c0_13], %17 {strides = array<i32>} : memref<1x2x4x400xf32, #tpu.memory_space<vmem>>, vector<1x1x4x400xf32>,
    return
  }
  func.func @transform_0(%arg0: i32, %arg1: i32, %arg2: i32, %arg3: memref<2x2xf32, #tpu.memory_space<smem>>) -> (i32, i32, i32) {
    %c0_i32 = arith.constant 0 : i32
    return %arg0, %arg1, %arg2 : i32, i32, i32
  }
  func.func @transform_1(%arg0: i32, %arg1: i32, %arg2: i32, %arg3: memref<2x2xf32, #tpu.memory_space<smem>>) -> (i32, i32, i32) {
    %c0_i32 = arith.constant 0 : i32
    return %arg0, %arg1, %arg2 : i32, i32, i32
  }
  func.func @transform_2(%arg0: i32, %arg1: i32, %arg2: i32, %arg3: memref<2x2xf32, #tpu.memory_space<smem>>) -> (i32, i32, i32, i32) {
    %c0_i32 = arith.constant 0 : i32
    %c0_i32_0 = arith.constant 0 : i32
    return %arg0, %c0_i32, %arg1, %arg2 : i32, i32, i32, i32
  }
}

module attributes {stable_mosaic.version = 11 : i64} {
  func.func @kernel(%arg0: i32, %arg1: i32, %arg2: i32, %arg3: memref<2x2xf32, #tpu.memory_space<smem>>, %arg4: memref<1x8x128xf32, #tpu.memory_space<vmem>>, %arg5: memref<1x8x128xf32, #tpu.memory_space<vmem>>, %arg6: memref<1x2x8x128xf32, #tpu.memory_space<vmem>>) attributes {dimension_semantics = [#tpu.dimension_semantics<parallel>, #tpu.dimension_semantics<parallel>, #tpu.dimension_semantics<parallel>], iteration_bounds = array<i64: 2, 1, 1>, scalar_prefetch = 1 : i64, scratch_operands = 0 : i64, tpu.core_type = #tpu.core_type<tc>, window_params = [{transform_indices = @transform_0, window_bounds = array<i64: 1, 8, 128>}, {transform_indices = @transform_1, window_bounds = array<i64: 1, 8, 128>}, {transform_indices = @transform_2, window_bounds = array<i64: 1, 2, 8, 128>}]} {
    %c0 = arith.constant 0 : index
    %c0_0 = arith.constant 0 : index
    %c0_1 = arith.constant 0 : index
    %0 = vector.load %arg4[%c0, %c0_0, %c0_1] : memref<1x8x128xf32, #tpu.memory_space<vmem>>, vector<1x8x128xf32>
    %1 = vector.shape_cast %0 : vector<1x8x128xf32> to vector<8x128xf32>
    %2 = arith.index_cast %arg0 : i32 to index
    %c0_2 = arith.constant 0 : index
    %3 = memref.load %arg3[%2, %c0_2] : memref<2x2xf32, #tpu.memory_space<smem>>
    %4 = vector.broadcast %3 : f32 to vector<8x128xf32>
    %5 = arith.mulf %1, %4 : vector<8x128xf32>
    %c0_3 = arith.constant 0 : index
    %c0_4 = arith.constant 0 : index
    %c0_5 = arith.constant 0 : index
    %c0_6 = arith.constant 0 : index
    %6 = vector.load %arg6[%c0_3, %c0_4, %c0_5, %c0_6] : memref<1x2x8x128xf32, #tpu.memory_space<vmem>>, vector<1x1x8x128xf32>
    %7 = vector.shape_cast %6 : vector<1x1x8x128xf32> to vector<8x128xf32>
    %8 = vector.shape_cast %5 : vector<8x128xf32> to vector<1x1x8x128xf32>
    tpu.vector_store %arg6[%c0_3, %c0_4, %c0_5, %c0_6], %8 {strides = array<i32>} : memref<1x2x8x128xf32, #tpu.memory_space<vmem>>, vector<1x1x8x128xf32>,
    %c0_7 = arith.constant 0 : index
    %c0_8 = arith.constant 0 : index
    %c0_9 = arith.constant 0 : index
    %9 = vector.load %arg5[%c0_7, %c0_8, %c0_9] : memref<1x8x128xf32, #tpu.memory_space<vmem>>, vector<1x8x128xf32>
    %10 = vector.shape_cast %9 : vector<1x8x128xf32> to vector<8x128xf32>
    %11 = arith.index_cast %arg0 : i32 to index
    %c1 = arith.constant 1 : index
    %12 = memref.load %arg3[%11, %c1] : memref<2x2xf32, #tpu.memory_space<smem>>
    %13 = vector.broadcast %12 : f32 to vector<8x128xf32>
    %14 = arith.mulf %10, %13 : vector<8x128xf32>
    %c0_10 = arith.constant 0 : index
    %c1_11 = arith.constant 1 : index
    %c0_12 = arith.constant 0 : index
    %c0_13 = arith.constant 0 : index
    %15 = vector.load %arg6[%c0_10, %c1_11, %c0_12, %c0_13] : memref<1x2x8x128xf32, #tpu.memory_space<vmem>>, vector<1x1x8x128xf32>
    %16 = vector.shape_cast %15 : vector<1x1x8x128xf32> to vector<8x128xf32>
    %17 = vector.shape_cast %14 : vector<8x128xf32> to vector<1x1x8x128xf32>
    tpu.vector_store %arg6[%c0_10, %c1_11, %c0_12, %c0_13], %17 {strides = array<i32>} : memref<1x2x8x128xf32, #tpu.memory_space<vmem>>, vector<1x1x8x128xf32>,
    return
  }
  func.func @transform_0(%arg0: i32, %arg1: i32, %arg2: i32, %arg3: memref<2x2xf32, #tpu.memory_space<smem>>) -> (i32, i32, i32) {
    %c0_i32 = arith.constant 0 : i32
    return %arg0, %arg1, %arg2 : i32, i32, i32
  }
  func.func @transform_1(%arg0: i32, %arg1: i32, %arg2: i32, %arg3: memref<2x2xf32, #tpu.memory_space<smem>>) -> (i32, i32, i32) {
    %c0_i32 = arith.constant 0 : i32
    return %arg0, %arg1, %arg2 : i32, i32, i32
  }
  func.func @transform_2(%arg0: i32, %arg1: i32, %arg2: i32, %arg3: memref<2x2xf32, #tpu.memory_space<smem>>) -> (i32, i32, i32, i32) {
    %c0_i32 = arith.constant 0 : i32
    %c0_i32_0 = arith.constant 0 : i32
    return %arg0, %c0_i32, %arg1, %arg2 : i32, i32, i32, i32
  }
}

</mosaic_0001>

<bundles_post_ra>
// kernel: merge_inputs_pallas.4
= control target key start
LH: loop header
LB: loop body
LE: loop exit
PB: predicated region body
PF: predicated region fallthrough
CT: control target
= control target key end

     0   :  { %s641_s0 = inlined_call_operand.vmem [shape: f32[2,2], index: 0, kind: input, shape index: {}]   ;;  %s642_s1 = inlined_call_operand.vmem [shape: f32[2,8,1024], index: 1, kind: input, shape index: {}]   ;;  %s643_s2 = inlined_call_operand.vmem [shape: f32[2,8,1024], index: 2, kind: input, shape index: {}]   ;;  %s644_s3 = inlined_call_operand.vmem [shape: f32[2,2,8,1024], index: 3, kind: output, shape index: {}]  }
   0x1   :  { %s8_s14 = sshll.u32 %s641_s0, 4  ;;  %s9_s14 = int_to_ptr.vmem [resolvable:$true] %s8_s14 }
   0x2   :  { %s512_s15 = scalar_lea.vmem %s9_s14, 32  ;;  %p517_p1 = scmp.lt.s32.totalorder %s9_s14, %s9_s14 }
   0x3   :  { %p513_p0 = scmp.ne.s32.totalorder %s9_s14, %s512_s15  ;;  %p518_p2 = scmp.lt.s32.totalorder %s512_s15, %s512_s15 }
   0x5   :  { %p519_p3 = por %p518_p2, %p517_p1 }
   0x7   :  { %p520_p4 = pnand %p519_p3, %p513_p0 }
   0x9   :  { %523 = shalt.err (!%p520_p4)  }
   0xa   :  { %s550_s16 = smov [#allocation3]  }
   0xb   :  { %11 = dma.vmem_to_smem %s9_s14, 32, %s550_s16, [#allocation2] }
   0xc   :  { %536 = dma.done.wait [#allocation2], 32 }
   0xd   :  { %537 = vsyncadd [#allocation2], 4294967264 }
   0xe   :  { %13 = sfence }
   0xf   :  { %s574_s17 = smov 0   ;;  %s576_s18 = smov 0  }
  0x10   :  { %s578_s19 = smov 0  }
  0x11 LB: > { %s38_s0 = sadd.s32 1, %s544_s18  ;;  %p466_p5 = scmp.ge.s32.totalorder %s548_s19, 1  ;;  %s548_s19 = sphi %s578_s19, %s19_s19   ;;  %s544_s18 = sphi %s576_s18, %s646_s18   ;;  %s540_s17 = sphi %s574_s17, %s645_s17  }
  0x12   : > { %p40_p6 = scmp.ge.s32.totalorder %s38_s0, 2  ;;  %p178_p7 = scmp.lt.s32.totalorder %s548_s19, 3 }
  0x14   : > { %s648_s0 = smov (%p40_p6, %s38_s0), 0  ;;  %p179_p8 = pnand %p466_p5, %p178_p7 }
  0x15   : > { %p230_p9 = scmp.lt.s32.totalorder (!%p179_p8), %s540_s17, 1  ;;  %s473_s20 = sshll.u32 (!%p179_p8), %s540_s17, 7 }
  0x16   : > { %182 = sbr.rel (%p179_p8) target bundleno = 44 (0x2c), region = 28  ;;  %s280_s21 = sld [smem:[#allocation3 + %s473_s20]] (!%p179_p8) }
  0x17   : > { %s306_s22 = sadd.s32 (!%p179_p8), 1, %s473_s20 }
  0x18   : > { %s592_s23 = sld [smem:[#allocation3 + %s306_s22]] (!%p179_p8) }
  0x1c   : > { %v281_v3 = vstv (!%p179_p8), %s280_s21 }
  0x1d   : > { %s650_s17 = smov (!%p230_p9, %s540_s17), 1 }
  0x1e   : > { %s484_s24 = sshll.u32 %s650_s17, 6  ;;  %s486_s25 = sshll.u32 %s650_s17, 7  ;;  %v308_v21 = vstv %s592_s23 }
  0x1f   : > { %s241_s28 = scalar_lea.vmem %s642_s1, %s484_s24  ;;  %s600_s4 = scalar_lea.vmem %s643_s2, %s484_s24 }
  0x20   : > { %v271_v0 = vld [vmem:[%s241_s28] sm:$0xff]  ;;  %v272_v1 = vld [vmem:[%s241_s28 + $0x8] sm:$0xff]  ;;  %v273_v2 = vld [vmem:[%s241_s28 + $0x10] sm:$0xff]  ;;  %s605_s7 = scalar_lea.vmem %s644_s3, %s486_s25 }
  0x21   : > { %v274_v4 = vld [vmem:[%s241_s28 + $0x18] sm:$0xff]  ;;  %v275_v5 = vld [vmem:[%s241_s28 + $0x20] sm:$0xff]  ;;  %v276_v6 = vld [vmem:[%s241_s28 + $0x28] sm:$0xff]  ;;  %v282_v7 = vmul.f32 %v281_v3, %v271_v0  ;;  %v283_v8 = vmul.f32 %v281_v3, %v272_v1  ;;  %v284_v9 = vmul.f32 %v281_v3, %v273_v2 }
  0x22   : > { %v285_v10 = vmul.f32 %v281_v3, %v274_v4  ;;  %v277_v11 = vld [vmem:[%s241_s28 + $0x30] sm:$0xff]  ;;  %v278_v12 = vld [vmem:[%s241_s28 + $0x38] sm:$0xff]  ;;  %v298_v13 = vld [vmem:[%s600_s4] sm:$0xff]  ;;  %v286_v14 = vmul.f32 %v281_v3, %v275_v5  ;;  %v287_v15 = vmul.f32 %v281_v3, %v276_v6 }
  0x23   : > { %v288_v16 = vmul.f32 %v281_v3, %v277_v11  ;;  %v289_v17 = vmul.f32 %v281_v3, %v278_v12  ;;  %v299_v18 = vld [vmem:[%s600_s4 + $0x8] sm:$0xff]  ;;  %v300_v19 = vld [vmem:[%s600_s4 + $0x10] sm:$0xff]  ;;  %v301_v20 = vld [vmem:[%s600_s4 + $0x18] sm:$0xff]  ;;  %290 = vst [vmem:[%s605_s7] sm:$0xff] %v282_v7  ;;  %v309_v25 = vmul.f32 %v308_v21, %v298_v13 }
  0x24   : > { %291 = vst [vmem:[%s605_s7 + $0x8] sm:$0xff] %v283_v8  ;;  %292 = vst [vmem:[%s605_s7 + $0x10] sm:$0xff] %v284_v9  ;;  %v302_v22 = vld [vmem:[%s600_s4 + $0x20] sm:$0xff]  ;;  %v303_v23 = vld [vmem:[%s600_s4 + $0x28] sm:$0xff]  ;;  %v310_v26 = vmul.f32 %v308_v21, %v299_v18  ;;  %v311_v27 = vmul.f32 %v308_v21, %v300_v19  ;;  %v312_v28 = vmul.f32 %v308_v21, %v301_v20 }
  0x25   : > { %293 = vst [vmem:[%s605_s7 + $0x18] sm:$0xff] %v285_v10  ;;  %v304_v24 = vld [vmem:[%s600_s4 + $0x30] sm:$0xff]  ;;  %294 = vst [vmem:[%s605_s7 + $0x20] sm:$0xff] %v286_v14  ;;  %v305_v29 = vld [vmem:[%s600_s4 + $0x38] sm:$0xff]  ;;  %v313_v30 = vmul.f32 %v308_v21, %v302_v22  ;;  %v314_v31 = vmul.f32 %v308_v21, %v303_v23 }
  0x26   : > { %295 = vst [vmem:[%s605_s7 + $0x28] sm:$0xff] %v287_v15  ;;  %296 = vst [vmem:[%s605_s7 + $0x30] sm:$0xff] %v288_v16  ;;  %v315_v32 = vmul.f32 %v308_v21, %v304_v24  ;;  %v316_v33 = vmul.f32 %v308_v21, %v305_v29 }
  0x27   : > { %297 = vst [vmem:[%s605_s7 + $0x38] sm:$0xff] %v289_v17  ;;  %474 = vst [vmem:[%s605_s7 + $0x40] sm:$0xff] %v309_v25 }
  0x28   : > { %475 = vst [vmem:[%s605_s7 + $0x48] sm:$0xff] %v310_v26  ;;  %476 = vst [vmem:[%s605_s7 + $0x50] sm:$0xff] %v311_v27 }
  0x29   : > { %477 = vst [vmem:[%s605_s7 + $0x58] sm:$0xff] %v312_v28  ;;  %478 = vst [vmem:[%s605_s7 + $0x60] sm:$0xff] %v313_v30 }
  0x2a   : > { %479 = vst [vmem:[%s605_s7 + $0x68] sm:$0xff] %v314_v31  ;;  %480 = vst [vmem:[%s605_s7 + $0x70] sm:$0xff] %v315_v32 }
  0x2b   : > { %481 = vst [vmem:[%s605_s7 + $0x78] sm:$0xff] %v316_v33 }
  0x2c PF: > { %s19_s19 = sadd.s32 1, %s548_s19   ;;  %s645_s17 = smov %s544_s18 }
  0x2d   : > { %p16_p10 = scmp.ge.s32.totalorder %s19_s19, 4   ;;  %s646_s18 = smov %s648_s0 }
  0x2f   :  { %18 = sbr.rel (!%p16_p10) target bundleno = 17 (0x11), region = 62 }

// kernel: merge_inputs_pallas.5
= control target key start
LH: loop header
LB: loop body
LE: loop exit
PB: predicated region body
PF: predicated region fallthrough
CT: control target
= control target key end

     0   :  { %s571_s0 = inlined_call_operand.vmem [shape: f32[2,2], index: 0, kind: input, shape index: {}]   ;;  %s572_s1 = inlined_call_operand.vmem [shape: f32[2,4,400], index: 1, kind: input, shape index: {}]   ;;  %s573_s2 = inlined_call_operand.vmem [shape: f32[2,4,400], index: 2, kind: input, shape index: {}]   ;;  %s574_s3 = inlined_call_operand.vmem [shape: f32[2,2,4,400], index: 3, kind: output, shape index: {}]  }
   0x1   :  { %s8_s14 = sshll.u32 %s571_s0, 4  ;;  %s9_s14 = int_to_ptr.vmem [resolvable:$true] %s8_s14 }
   0x2   :  { %s473_s15 = scalar_lea.vmem %s9_s14, 32  ;;  %p478_p1 = scmp.lt.s32.totalorder %s9_s14, %s9_s14 }
   0x3   :  { %p474_p0 = scmp.ne.s32.totalorder %s9_s14, %s473_s15  ;;  %p479_p2 = scmp.lt.s32.totalorder %s473_s15, %s473_s15 }
   0x5   :  { %p480_p3 = por %p479_p2, %p478_p1 }
   0x7   :  { %p481_p4 = pnand %p480_p3, %p474_p0 }
   0x9   :  { %484 = shalt.err (!%p481_p4)  }
   0xa   :  { %s511_s16 = smov [#allocation3]  }
   0xb   :  { %11 = dma.vmem_to_smem %s9_s14, 32, %s511_s16, [#allocation2] }
   0xc   :  { %497 = dma.done.wait [#allocation2], 32 }
   0xd   :  { %498 = vsyncadd [#allocation2], 4294967264 }
   0xe   :  { %13 = sfence }
   0xf   :  { %s535_s17 = smov 0   ;;  %s537_s18 = smov 0  }
  0x10   :  { %s539_s19 = smov 0  }
  0x11 LB: > { %s38_s0 = sadd.s32 1, %s505_s18  ;;  %p433_p5 = scmp.ge.s32.totalorder %s509_s19, 1  ;;  %s509_s19 = sphi %s539_s19, %s19_s19   ;;  %s505_s18 = sphi %s537_s18, %s576_s18   ;;  %s501_s17 = sphi %s535_s17, %s575_s17  }
  0x12   : > { %p40_p6 = scmp.ge.s32.totalorder %s38_s0, 2  ;;  %p178_p7 = scmp.lt.s32.totalorder %s509_s19, 3 }
  0x14   : > { %s578_s0 = smov (%p40_p6, %s38_s0), 0  ;;  %p179_p8 = pnand %p433_p5, %p178_p7 }
  0x15   : > { %p230_p9 = scmp.lt.s32.totalorder (!%p179_p8), %s501_s17, 1  ;;  %s440_s20 = sshll.u32 (!%p179_p8), %s501_s17, 7  ;;  %vm279_vm0 = vcmask (!%p179_p8), 1043456   ;;  %vm280_vm1 = vcmask (!%p179_p8), 130052  }
  0x16   : > { %182 = sbr.rel (%p179_p8) target bundleno = 37 (0x25), region = 28  ;;  %s274_s21 = sld [smem:[#allocation3 + %s440_s20]] (!%p179_p8)  ;;  %vm281_vm2 = vmor (!%p179_p8), %vm280_vm1, %vm279_vm0 }
  0x17   : > { %s285_s22 = sadd.s32 (!%p179_p8), 1, %s440_s20 }
  0x18   : > { %s286_s23 = sld [smem:[#allocation3 + %s285_s22]] (!%p179_p8) }
  0x1c   : > { %v275_v2 = vstv (!%p179_p8), %s274_s21 }
  0x1d   : > { %s580_s17 = smov (!%p230_p9, %s501_s17), 1 }
  0x1e   : > { %s445_s24 = sshll.u32 %s580_s17, 4  ;;  %s447_s25 = sshll.u32 %s580_s17, 5  ;;  %v287_v7 = vstv %s286_s23 }
  0x1f   : > { %s241_s28 = scalar_lea.vmem %s572_s1, %s445_s24  ;;  %s255_s4 = scalar_lea.vmem %s573_s2, %s445_s24 }
  0x20   : > { %v271_v0 = vld [vmem:[%s241_s28] sm:$0xff]  ;;  %v272_v1 = vld [vmem:[%s241_s28 + $0x8] sm:$0xff]  ;;  %s269_s7 = scalar_lea.vmem %s574_s3, %s447_s25 }
  0x21   : > { %v283_v3 = vld [vmem:[%s255_s4] sm:$0xff]  ;;  %v284_v4 = vld [vmem:[%s255_s4 + $0x8] sm:$0xff]  ;;  %v276_v5 = vmul.f32 %v275_v2, %v271_v0  ;;  %v277_v6 = vmul.f32 %v275_v2, %v272_v1 }
  0x22   : > { %v288_v8 = vmul.f32 %v287_v7, %v283_v3  ;;  %v289_v9 = vmul.f32 %v287_v7, %v284_v4 }
  0x23   : > { %278 = vst [vmem:[%s269_s7] sm:$0xff] %v276_v5  ;;  %282 = vst.msk [vmem:[%s269_s7 + $0x8] sm:$0xff] %vm281_vm2, %v277_v6 }
  0x24   : > { %441 = vst [vmem:[%s269_s7 + $0x10] sm:$0xff] %v288_v8  ;;  %442 = vst.msk [vmem:[%s269_s7 + $0x18] sm:$0xff] %vm281_vm2, %v289_v9 }
  0x25 PF: > { %s19_s19 = sadd.s32 1, %s509_s19   ;;  %s575_s17 = smov %s505_s18 }
  0x26   : > { %p16_p10 = scmp.ge.s32.totalorder %s19_s19, 4   ;;  %s576_s18 = smov %s578_s0 }
  0x28   :  { %18 = sbr.rel (!%p16_p10) target bundleno = 17 (0x11), region = 62 }

// kernel: merge_inputs_pallas.3
= control target key start
LH: loop header
LB: loop body
LE: loop exit
PB: predicated region body
PF: predicated region fallthrough
CT: control target
= control target key end

     0   :  { %s505_s0 = inlined_call_operand.vmem [shape: f32[2,2], index: 0, kind: input, shape index: {}]   ;;  %s506_s1 = inlined_call_operand.vmem [shape: f32[2,8,128], index: 1, kind: input, shape index: {}]   ;;  %s507_s2 = inlined_call_operand.vmem [shape: f32[2,8,128], index: 2, kind: input, shape index: {}]   ;;  %s508_s3 = inlined_call_operand.vmem [shape: f32[2,2,8,128], index: 3, kind: output, shape index: {}]  }
   0x1   :  { %s8_s14 = sshll.u32 %s505_s0, 4  ;;  %s9_s14 = int_to_ptr.vmem [resolvable:$true] %s8_s14 }
   0x2   :  { %s410_s15 = scalar_lea.vmem %s9_s14, 32  ;;  %p415_p1 = scmp.lt.s32.totalorder %s9_s14, %s9_s14 }
   0x3   :  { %p411_p0 = scmp.ne.s32.totalorder %s9_s14, %s410_s15  ;;  %p416_p2 = scmp.lt.s32.totalorder %s410_s15, %s410_s15 }
   0x5   :  { %p417_p3 = por %p416_p2, %p415_p1 }
   0x7   :  { %p418_p4 = pnand %p417_p3, %p411_p0 }
   0x9   :  { %421 = shalt.err (!%p418_p4)  }
   0xa   :  { %s448_s16 = smov [#allocation3]  }
   0xb   :  { %11 = dma.vmem_to_smem %s9_s14, 32, %s448_s16, [#allocation2] }
   0xc   :  { %434 = dma.done.wait [#allocation2], 32 }
   0xd   :  { %435 = vsyncadd [#allocation2], 4294967264 }
   0xe   :  { %13 = sfence }
   0xf   :  { %s472_s17 = smov 0   ;;  %s474_s18 = smov 0  }
  0x10   :  { %s476_s19 = smov 0  }
  0x11 LB: > { %s38_s0 = sadd.s32 1, %s442_s18  ;;  %p375_p5 = scmp.ge.s32.totalorder %s446_s19, 1  ;;  %s446_s19 = sphi %s476_s19, %s19_s19   ;;  %s442_s18 = sphi %s474_s18, %s510_s18   ;;  %s438_s17 = sphi %s472_s17, %s509_s17  }
  0x12   : > { %p40_p6 = scmp.ge.s32.totalorder %s38_s0, 2  ;;  %p170_p7 = scmp.lt.s32.totalorder %s446_s19, 3 }
  0x14   : > { %s512_s0 = smov (%p40_p6, %s38_s0), 0  ;;  %p171_p8 = pnand %p375_p5, %p170_p7 }
  0x15   : > { %p213_p9 = scmp.lt.s32.totalorder (!%p171_p8), %s438_s17, 1  ;;  %s380_s20 = sshll.u32 (!%p171_p8), %s438_s17, 7 }
  0x16   : > { %174 = sbr.rel (%p171_p8) target bundleno = 37 (0x25), region = 28  ;;  %s246_s21 = sld [smem:[#allocation3 + %s380_s20]] (!%p171_p8) }
  0x17   : > { %s251_s22 = sadd.s32 (!%p171_p8), 1, %s380_s20 }
  0x18   : > { %s252_s23 = sld [smem:[#allocation3 + %s251_s22]] (!%p171_p8) }
  0x1c   : > { %v247_v1 = vstv (!%p171_p8), %s246_s21 }
  0x1d   : > { %s514_s17 = smov (!%p213_p9, %s438_s17), 1 }
  0x1e   : > { %s376_s24 = sshll.u32 %s514_s17, 3  ;;  %s384_s25 = sshll.u32 %s514_s17, 4  ;;  %v253_v4 = vstv %s252_s23 }
  0x1f   : > { %s222_s28 = scalar_lea.vmem %s506_s1, %s376_s24  ;;  %s232_s4 = scalar_lea.vmem %s507_s2, %s376_s24 }
  0x20   : > { %v244_v0 = vld [vmem:[%s222_s28] sm:$0xff]  ;;  %s243_s7 = scalar_lea.vmem %s508_s3, %s384_s25 }
  0x21   : > { %v250_v2 = vld [vmem:[%s232_s4] sm:$0xff]  ;;  %v248_v3 = vmul.f32 %v247_v1, %v244_v0 }
  0x22   : > { %v254_v5 = vmul.f32 %v253_v4, %v250_v2 }
  0x23   : > { %249 = vst [vmem:[%s243_s7] sm:$0xff] %v248_v3 }
  0x24   : > { %381 = vst [vmem:[%s243_s7 + $0x8] sm:$0xff] %v254_v5 }
  0x25 PF: > { %s19_s19 = sadd.s32 1, %s446_s19   ;;  %s509_s17 = smov %s442_s18 }
  0x26   : > { %p16_p10 = scmp.ge.s32.totalorder %s19_s19, 4   ;;  %s510_s18 = smov %s512_s0 }
  0x28   :  { %18 = sbr.rel (!%p16_p10) target bundleno = 17 (0x11), region = 62 }

</bundles_post_ra>
